<compile_context>
chip_gen: v5e
topology: v5e:2x2
jax: 0.10.0
libtpu: 0.0.40
codegen_flags: <defaults>
</compile_context>

<pallas_src>
import functools

import jax
import jax.numpy as jnp
from jax.experimental import pallas as pl
from jax.experimental.pallas import tpu as pltpu

ACT_FN = jnp.tanh  # act_fn='tanh'

VMEM_LIMIT_BYTES = 64 * 1024 * 1024  # <= physical VMEM on v5e/v6e (128 MiB) and v7x (64 MiB)


def _sigmoid(x):
    # exp + reciprocal both land on the EUP slot (approx recip), VALU stays free.
    return pl.reciprocal(1.0 + jnp.exp(-x), approx=True)


def _pick_tile(total, candidates):
    for c in candidates:
        if total % c == 0:
            return c
    return total


# ---------------------------------------------------------------------------
# Encoder kernel: streamed D_in contraction + fused heads + reparameterize.
# grid = (batch tiles, D_in chunks); D_in chunk axis MUST be innermost/arbitrary.
# ---------------------------------------------------------------------------
def bivae_user_encoder_kernel(x_ref, w1_ref, b1_ref, wh_ref, bh_ref, eps_ref,
                              enc_ref, hacc_ref, *, kp):
    dj = pl.program_id(1)

    @pl.when(dj == 0)
    def _init():
        hacc_ref[...] = jnp.zeros_like(hacc_ref)

    # Streamed piece of the (tile_b, D_in) @ (D_in, H) contraction; bf16
    # operands, f32 accumulation in VMEM scratch.
    hacc_ref[...] += jnp.dot(x_ref[...], w1_ref[...],
                             preferred_element_type=jnp.float32)

    @pl.when(dj == pl.num_programs(1) - 1)
    def _heads():
        h = ACT_FN(hacc_ref[...] + b1_ref[...])                       # f32
        # Fused mu/std heads: single (tile_b, H) @ (H, 2*Kpad) matmul.
        ms = jnp.dot(h.astype(wh_ref.dtype), wh_ref[...],
                     preferred_element_type=jnp.float32) + bh_ref[...]
        mu = ms[:, :kp]                    # lane-tile aligned slices (kp = 128*m)
        std = _sigmoid(ms[:, kp:])
        theta = mu + eps_ref[...] * std    # padded lanes: eps==0 -> theta==0
        # Lane-packed (tile_b, 3*Kpad) slab: [theta | mu | std]
        enc_ref[...] = jnp.concatenate([theta, mu, std], axis=-1)


# ---------------------------------------------------------------------------
# Decoder kernel: recon tile = sigmoid(theta @ beta^T tile).
# ---------------------------------------------------------------------------
def bivae_user_decoder_kernel(theta_ref, betaT_ref, recon_ref):
    logits = jnp.dot(theta_ref[...], betaT_ref[...],
                     preferred_element_type=jnp.float32)
    recon_ref[...] = _sigmoid(logits).astype(recon_ref.dtype)


def bivae_forward_user(x, params, beta, eps, *, tile_b=None, tile_n=None,
                       tile_d=None, compute_dtype=jnp.bfloat16,
                       recon_dtype=jnp.bfloat16):
    """Returns (theta, recon, mu, std) for the user branch of BiVAE.forward."""
    B, D_in = x.shape
    H = params["W1"].shape[1]
    K = params["Wmu"].shape[1]
    N = beta.shape[0]
    KP = max(128, ((K + 127) // 128) * 128)    # latent dim padded to lane width

    if tile_b is None:
        tile_b = _pick_tile(B, (256, 128, 64, 32, 16, 8))
        # v7x has 2 TensorCores and the batch axis is the only parallel axis:
        # make sure there are >= 2 batch tiles so neither core idles.
        if B // tile_b < 2 and tile_b % 2 == 0 and tile_b >= 16:
            tile_b //= 2
    tile_n = tile_n if tile_n is not None else _pick_tile(N, (2048, 1024, 512, 256, 128))
    tile_d = tile_d if tile_d is not None else _pick_tile(D_in, (2048, 1024, 512, 256, 128))
    assert B % tile_b == 0, "batch must be divisible by tile_b"
    assert N % tile_n == 0, "n_items must be divisible by tile_n"
    assert D_in % tile_d == 0, "input dim must be divisible by tile_d"

    f32 = jnp.float32

    # bf16 MXU operands (accumulation stays f32); biases / eps stay f32.
    x_c = x.astype(compute_dtype)
    w1_c = params["W1"].astype(compute_dtype)

    def pad_lanes(a, width):
        return jnp.pad(a, ((0, 0), (0, width - a.shape[1])))

    # Fused, K->Kpad zero-padded heads (done once in XLA).
    w_heads = jnp.concatenate([pad_lanes(params["Wmu"], KP),
                               pad_lanes(params["Wstd"], KP)],
                              axis=1).astype(compute_dtype)        # (H, 2*KP)
    b_heads = jnp.concatenate([pad_lanes(params["bmu"], KP),
                               pad_lanes(params["bstd"], KP)],
                              axis=1).astype(f32)                  # (1, 2*KP)
    eps_p = pad_lanes(eps, KP).astype(f32)                         # (B, KP), padded lanes = 0
    # Pre-transposed, row-padded beta so the decoder never transposes in VMEM
    # and the contraction uses full 128-lane rows.
    beta_t = jnp.zeros((KP, N), compute_dtype).at[:K, :].set(
        beta.T.astype(compute_dtype))                              # (KP, N)

    itm = jnp.dtype(compute_dtype).itemsize

    # ---------------- encoder call ----------------
    enc_cost = pl.CostEstimate(
        flops=int(2 * B * D_in * H + 2 * B * H * 2 * KP + 6 * B * KP),
        transcendentals=int(B * H + B * KP),
        bytes_accessed=int(B * D_in * itm + D_in * H * itm + H * 2 * KP * itm
                           + B * KP * 4 + B * 3 * KP * 4),
    )
    enc = pl.pallas_call(
        functools.partial(bivae_user_encoder_kernel, kp=KP),
        out_shape=jax.ShapeDtypeStruct((B, 3 * KP), f32),
        grid=(B // tile_b, D_in // tile_d),
        in_specs=[
            pl.BlockSpec((tile_b, tile_d), lambda bi, dj: (bi, dj)),   # x, streamed over D_in
            pl.BlockSpec((tile_d, H),      lambda bi, dj: (dj, 0)),    # W1, streamed over D_in
            pl.BlockSpec((1, H),           lambda bi, dj: (0, 0)),     # b1
            pl.BlockSpec((H, 2 * KP),      lambda bi, dj: (0, 0)),     # fused head weights
            pl.BlockSpec((1, 2 * KP),      lambda bi, dj: (0, 0)),     # fused head bias
            pl.BlockSpec((tile_b, KP),     lambda bi, dj: (bi, 0)),    # eps
        ],
        # enc slab is resident across the D_in-chunk axis (written at last chunk)
        out_specs=pl.BlockSpec((tile_b, 3 * KP), lambda bi, dj: (bi, 0)),
        scratch_shapes=[pltpu.VMEM((tile_b, H), f32)],                 # h pre-activation acc
        compiler_params=pltpu.CompilerParams(
            dimension_semantics=("parallel", "arbitrary"),
            vmem_limit_bytes=VMEM_LIMIT_BYTES),
        cost_estimate=enc_cost,
    )(x_c, w1_c, params["b1"].astype(f32), w_heads, b_heads, eps_p)

    # ---------------- decoder call ----------------
    theta_p = enc[:, :KP].astype(compute_dtype)                       # (B, KP), tiny
    dec_cost = pl.CostEstimate(
        flops=int(2 * B * KP * N + 2 * B * N),
        transcendentals=int(B * N),
        bytes_accessed=int(KP * N * itm + B * KP * itm
                           + B * N * jnp.dtype(recon_dtype).itemsize),
    )
    recon = pl.pallas_call(
        bivae_user_decoder_kernel,
        out_shape=jax.ShapeDtypeStruct((B, N), recon_dtype),
        grid=(B // tile_b, N // tile_n),
        in_specs=[
            pl.BlockSpec((tile_b, KP), lambda bi, nj: (bi, 0)),        # theta (resident)
            pl.BlockSpec((KP, tile_n), lambda bi, nj: (0, nj)),        # beta^T (streamed over N)
        ],
        out_specs=pl.BlockSpec((tile_b, tile_n), lambda bi, nj: (bi, nj)),
        compiler_params=pltpu.CompilerParams(
            dimension_semantics=("parallel", "arbitrary"),
            vmem_limit_bytes=VMEM_LIMIT_BYTES),
        cost_estimate=dec_cost,
    )(theta_p, beta_t)

    theta = enc[:, :K]
    mu = enc[:, KP:KP + K]
    std = enc[:, 2 * KP:2 * KP + K]
    return theta, recon, mu, std


# ---------------------------------------------------------------------------
# Deterministic parameter construction (synthetic init, no checkpoint load)
# ---------------------------------------------------------------------------
def init_params(key, n_items, hidden, k):
    ks = jax.random.split(key, 8)
    scale1 = 1.0 / jnp.sqrt(n_items)
    scale2 = 1.0 / jnp.sqrt(hidden)
    params = {
        "W1": jax.random.uniform(ks[0], (n_items, hidden), jnp.float32, -scale1, scale1),
        "b1": jax.random.uniform(ks[1], (1, hidden), jnp.float32, -scale1, scale1),
        "Wmu": jax.random.uniform(ks[2], (hidden, k), jnp.float32, -scale2, scale2),
        "bmu": jax.random.uniform(ks[3], (1, k), jnp.float32, -scale2, scale2),
        "Wstd": jax.random.uniform(ks[4], (hidden, k), jnp.float32, -scale2, scale2),
        "bstd": jax.random.uniform(ks[5], (1, k), jnp.float32, -scale2, scale2),
    }
    # beta: item latent factors, randn * 0.01 (as in BiVAE.__init__)
    beta = jax.random.normal(ks[6], (n_items, k), jnp.float32) * 0.01
    return params, beta


def reference_forward(x, params, beta, eps):
    h = ACT_FN(x @ params["W1"] + params["b1"])
    mu = h @ params["Wmu"] + params["bmu"]
    std = jax.nn.sigmoid(h @ params["Wstd"] + params["bstd"])
    theta = mu + eps * std
    recon = jax.nn.sigmoid(theta @ beta.T)
    return theta, recon, mu, std


if __name__ == "__main__":
    # Small demo shapes that still exercise both tiling grids:
    # 16 users, 512 items, hidden=64, latent k=32 (padded to 128 in-kernel);
    # tiles: batch 8, D_in chunk 128, item tile 128 -> encoder grid (2, 4),
    # decoder grid (2, 4).
    batch, n_items, hidden, k = 16, 512, 64, 32
    tile_b, tile_d, tile_n = 8, 128, 128

    key = jax.random.PRNGKey(0)
    k_param, k_x, k_eps = jax.random.split(key, 3)

    params, beta = init_params(k_param, n_items, hidden, k)
    # binary implicit-feedback style input (user rating vectors)
    x = (jax.random.uniform(k_x, (batch, n_items)) > 0.8).astype(jnp.float32)
    # reparameterization noise (torch.randn_like(mu)), generated host-side
    eps = jax.random.normal(k_eps, (batch, k), jnp.float32)

    theta, recon, mu, std = bivae_forward_user(
        x, params, beta, eps, tile_b=tile_b, tile_n=tile_n, tile_d=tile_d)
    jax.block_until_ready((theta, recon, mu, std))

    # correctness check against plain-JAX f32 reference; tolerances account for
    # the intentional bf16 operand / bf16 recon precision (expected, not a bug).
    theta_r, recon_r, mu_r, std_r = reference_forward(x, params, beta, eps)
    assert jnp.allclose(theta, theta_r, atol=1e-2), "theta mismatch"
    assert jnp.allclose(mu, mu_r, atol=1e-2), "mu mismatch"
    assert jnp.allclose(std, std_r, atol=1e-2), "std mismatch"
    assert jnp.allclose(recon.astype(jnp.float32), recon_r, atol=1e-2), "recon mismatch"

    print("KERNEL_OK")
</pallas_src>

<mosaic_0001>
module attributes {stable_mosaic.version = 11 : i64} {
  func.func @bivae_user_encoder_kernel(%arg0: i32, %arg1: i32, %arg2: memref<8x128xbf16, #tpu.memory_space<vmem>>, %arg3: memref<128x64xbf16, #tpu.memory_space<vmem>>, %arg4: memref<1x64xf32, #tpu.memory_space<vmem>>, %arg5: memref<64x256xbf16, #tpu.memory_space<vmem>>, %arg6: memref<1x256xf32, #tpu.memory_space<vmem>>, %arg7: memref<8x128xf32, #tpu.memory_space<vmem>>, %arg8: memref<8x384xf32, #tpu.memory_space<vmem>>, %arg9: memref<8x64xf32, #tpu.memory_space<vmem>>) attributes {dimension_semantics = [#tpu.dimension_semantics<parallel>, #tpu.dimension_semantics<arbitrary>], iteration_bounds = array<i64: 2, 4>, scalar_prefetch = 0 : i64, scratch_operands = 1 : i64, tpu.core_type = #tpu.core_type<tc>, window_params = [{transform_indices = @transform_0, window_bounds = array<i64: 8, 128>}, {transform_indices = @transform_1, window_bounds = array<i64: 128, 64>}, {pipeline_mode = #tpu.pipeline_mode<synchronous>, transform_indices = @transform_2, window_bounds = array<i64: 1, 64>}, {pipeline_mode = #tpu.pipeline_mode<synchronous>, transform_indices = @transform_3, window_bounds = array<i64: 64, 256>}, {pipeline_mode = #tpu.pipeline_mode<synchronous>, transform_indices = @transform_4, window_bounds = array<i64: 1, 256>}, {transform_indices = @transform_5, window_bounds = array<i64: 8, 128>}, {transform_indices = @transform_6, window_bounds = array<i64: 8, 384>}]} {
    %c0_i32 = arith.constant 0 : i32
    %0 = arith.cmpi eq, %arg1, %c0_i32 : i32
    %1 = arith.extui %0 : i1 to i32
    %c0_i32_0 = arith.constant 0 : i32
    %2 = arith.cmpi ne, %1, %c0_i32_0 : i32
    scf.if %2 {
      %cst_9 = arith.constant 0.000000e+00 : f32
      %12 = vector.broadcast %cst_9 : f32 to vector<8x64xf32>
      %c0_10 = arith.constant 0 : index
      %c0_11 = arith.constant 0 : index
      %13 = vector.load %arg9[%c0_10, %c0_11] : memref<8x64xf32, #tpu.memory_space<vmem>>, vector<8x64xf32>
      tpu.vector_store %arg9[%c0_10, %c0_11], %12 {strides = array<i32>} : memref<8x64xf32, #tpu.memory_space<vmem>>, vector<8x64xf32>,
    } else {
    }
    %c0 = arith.constant 0 : index
    %c0_1 = arith.constant 0 : index
    %3 = vector.load %arg9[%c0, %c0_1] : memref<8x64xf32, #tpu.memory_space<vmem>>, vector<8x64xf32>
    %c0_2 = arith.constant 0 : index
    %c0_3 = arith.constant 0 : index
    %4 = vector.load %arg2[%c0_2, %c0_3] : memref<8x128xbf16, #tpu.memory_space<vmem>>, vector<8x128xbf16>
    %c0_4 = arith.constant 0 : index
    %c0_5 = arith.constant 0 : index
    %5 = vector.load %arg3[%c0_4, %c0_5] : memref<128x64xbf16, #tpu.memory_space<vmem>>, vector<128x64xbf16>
    %cst = arith.constant dense<0.000000e+00> : vector<8x64xf32>
    %6 = tpu.matmul %4, %5, %cst {dimension_numbers = #tpu.dot_dimension_numbers<[1], [0], [0], [1], [0, 0, 1, 1], [], []>} : vector<8x128xbf16>, vector<128x64xbf16>, vector<8x64xf32> -> vector<8x64xf32>
    %7 = arith.addf %3, %6 : vector<8x64xf32>
    %c0_6 = arith.constant 0 : index
    %c0_7 = arith.constant 0 : index
    %8 = vector.load %arg9[%c0_6, %c0_7] : memref<8x64xf32, #tpu.memory_space<vmem>>, vector<8x64xf32>
    tpu.vector_store %arg9[%c0_6, %c0_7], %7 {strides = array<i32>} : memref<8x64xf32, #tpu.memory_space<vmem>>, vector<8x64xf32>,
    %c3_i32 = arith.constant 3 : i32
    %9 = arith.cmpi eq, %arg1, %c3_i32 : i32
    %10 = arith.extui %9 : i1 to i32
    %c0_i32_8 = arith.constant 0 : i32
    %11 = arith.cmpi ne, %10, %c0_i32_8 : i32
    scf.if %11 {
      %c0_9 = arith.constant 0 : index
      %c0_10 = arith.constant 0 : index
      %12 = vector.load %arg9[%c0_9, %c0_10] : memref<8x64xf32, #tpu.memory_space<vmem>>, vector<8x64xf32>
      %c0_11 = arith.constant 0 : index
      %c0_12 = arith.constant 0 : index
      %13 = vector.load %arg4[%c0_11, %c0_12] : memref<1x64xf32, #tpu.memory_space<vmem>>, vector<1x64xf32>
      %14 = vector.broadcast %13 : vector<1x64xf32> to vector<8x64xf32>
      %15 = arith.addf %12, %14 : vector<8x64xf32>
      %16 = math.tanh %15 : vector<8x64xf32>
      %17 = arith.truncf %16 : vector<8x64xf32> to vector<8x64xbf16>
      %c0_13 = arith.constant 0 : index
      %c0_14 = arith.constant 0 : index
      %18 = vector.load %arg5[%c0_13, %c0_14] : memref<64x256xbf16, #tpu.memory_space<vmem>>, vector<64x256xbf16>
      %cst_15 = arith.constant dense<0.000000e+00> : vector<8x256xf32>
      %19 = tpu.matmul %17, %18, %cst_15 {dimension_numbers = #tpu.dot_dimension_numbers<[1], [0], [0], [1], [0, 0, 1, 1], [], []>} : vector<8x64xbf16>, vector<64x256xbf16>, vector<8x256xf32> -> vector<8x256xf32>
      %c0_16 = arith.constant 0 : index
      %c0_17 = arith.constant 0 : index
      %20 = vector.load %arg6[%c0_16, %c0_17] : memref<1x256xf32, #tpu.memory_space<vmem>>, vector<1x256xf32>
      %21 = vector.broadcast %20 : vector<1x256xf32> to vector<8x256xf32>
      %22 = arith.addf %19, %21 : vector<8x256xf32>
      %23 = vector.extract_strided_slice %22 {offsets = [0, 0], sizes = [8, 128], strides = [1, 1]} : vector<8x256xf32> to vector<8x128xf32>
      %24 = vector.extract_strided_slice %22 {offsets = [0, 128], sizes = [8, 128], strides = [1, 1]} : vector<8x256xf32> to vector<8x128xf32>
      %cst_18 = arith.constant 0.000000e+00 : f32
      %25 = vector.broadcast %cst_18 : f32 to vector<8x128xf32>
      %26 = arith.subf %25, %24 : vector<8x128xf32>
      %27 = math.exp %26 : vector<8x128xf32>
      %cst_19 = arith.constant 1.000000e+00 : f32
      %28 = vector.broadcast %cst_19 : f32 to vector<8x128xf32>
      %29 = arith.addf %28, %27 : vector<8x128xf32>
      %30 = tpu.reciprocal %29 {approx = true} : vector<8x128xf32> -> vector<8x128xf32>
      %c0_20 = arith.constant 0 : index
      %c0_21 = arith.constant 0 : index
      %31 = vector.load %arg7[%c0_20, %c0_21] : memref<8x128xf32, #tpu.memory_space<vmem>>, vector<8x128xf32>
      %32 = arith.mulf %31, %30 : vector<8x128xf32>
      %33 = arith.addf %23, %32 : vector<8x128xf32>
      %34 = tpu.concatenate %33, %23, %30 in 1 : vector<8x128xf32>, vector<8x128xf32>, vector<8x128xf32> -> vector<8x384xf32>
      %c0_22 = arith.constant 0 : index
      %c0_23 = arith.constant 0 : index
      %35 = vector.load %arg8[%c0_22, %c0_23] : memref<8x384xf32, #tpu.memory_space<vmem>>, vector<8x384xf32>
      tpu.vector_store %arg8[%c0_22, %c0_23], %34 {strides = array<i32>} : memref<8x384xf32, #tpu.memory_space<vmem>>, vector<8x384xf32>,
    } else {
    }
    return
  }
  func.func @transform_0(%arg0: i32, %arg1: i32) -> (i32, i32) {
    %c0_i32 = arith.constant 0 : i32
    return %arg0, %arg1 : i32, i32
  }
  func.func @transform_1(%arg0: i32, %arg1: i32) -> (i32, i32) {
    %c0_i32 = arith.constant 0 : i32
    %c0_i32_0 = arith.constant 0 : i32
    return %arg1, %c0_i32 : i32, i32
  }
  func.func @transform_2(%arg0: i32, %arg1: i32) -> (i32, i32) {
    %c0_i32 = arith.constant 0 : i32
    %c0_i32_0 = arith.constant 0 : i32
    %c0_i32_1 = arith.constant 0 : i32
    return %c0_i32, %c0_i32_0 : i32, i32
  }
  func.func @transform_3(%arg0: i32, %arg1: i32) -> (i32, i32) {
    %c0_i32 = arith.constant 0 : i32
    %c0_i32_0 = arith.constant 0 : i32
    %c0_i32_1 = arith.constant 0 : i32
    return %c0_i32, %c0_i32_0 : i32, i32
  }
  func.func @transform_4(%arg0: i32, %arg1: i32) -> (i32, i32) {
    %c0_i32 = arith.constant 0 : i32
    %c0_i32_0 = arith.constant 0 : i32
    %c0_i32_1 = arith.constant 0 : i32
    return %c0_i32, %c0_i32_0 : i32, i32
  }
  func.func @transform_5(%arg0: i32, %arg1: i32) -> (i32, i32) {
    %c0_i32 = arith.constant 0 : i32
    %c0_i32_0 = arith.constant 0 : i32
    return %arg0, %c0_i32 : i32, i32
  }
  func.func @transform_6(%arg0: i32, %arg1: i32) -> (i32, i32) {
    %c0_i32 = arith.constant 0 : i32
    %c0_i32_0 = arith.constant 0 : i32
    return %arg0, %c0_i32 : i32, i32
  }
}

</mosaic_0001>

<bundles_post_ra>
// kernel: tpu_custom_call.1
= control target key start
LH: loop header
LB: loop body
LE: loop exit
PB: predicated region body
PF: predicated region fallthrough
CT: control target
= control target key end

     0   :  { %11 = vsyncpa [#allocation4], 0  ;;  %s1132_s0 = inlined_call_operand.vmem [shape: bf16[16,512], index: 0, kind: input, shape index: {}]   ;;  %s1133_s1 = inlined_call_operand.vmem [shape: bf16[512,64], index: 1, kind: input, shape index: {}]   ;;  %s1134_s2 = inlined_call_operand.vmem [shape: f32[1,64], index: 2, kind: input, shape index: {}]   ;;  %s1135_s3 = inlined_call_operand.vmem [shape: bf16[64,256], index: 3, kind: input, shape index: {}]   ;;  %s1136_s4 = inlined_call_operand.vmem [shape: f32[1,256], index: 4, kind: input, shape index: {}]   ;;  %s1137_s5 = inlined_call_operand.vmem [shape: f32[16,128], index: 5, kind: input, shape index: {}]   ;;  %s1138_s6 = inlined_call_operand.hbm [shape: f32[16,384], index: 6, kind: output, shape index: {}]  }
   0x1   :  { %13 = vsyncpa [#allocation4 + $0x1], 0  ;;  %s934_s21 = smov 0   ;;  %s936_s22 = smov 0  }
   0x2   :  { %s938_s23 = smov 0   ;;  %s940_s24 = smov 0  }
   0x3   :  { %s942_s25 = smov 0   ;;  %s944_s26 = smov 0  }
   0x4   :  { %s946_s27 = smov 0   ;;  %s948_s28 = smov 0  }
   0x5 LB: > { %1146 = sst [smem:[#allocation6_spill]] %s868_s21  ;;  %s624_s29 = sadd.s32 4294967295, %s896_s28   ;;  %s896_s28 = sphi %s948_s28, %s19_s28   ;;  %s892_s27 = sphi %s946_s27, %s1164_s27   ;;  %s888_s26 = sphi %s944_s26, %s1163_s26   ;;  %s884_s25 = sphi %s942_s25, %s1162_s25   ;;  %s880_s24 = sphi %s940_s24, %s1161_s24   ;;  %s876_s23 = sphi %s938_s23, %s1160_s23   ;;  %s872_s22 = sphi %s936_s22, %s1166_s22   ;;  %s868_s21 = sphi %s934_s21, %s1165_s21  }
   0x6   : > { %1147 = sst [smem:[#allocation7_spill]] %s876_s23  ;;  %s625_s30 = sadd.s32 4294967294, %s896_s28  }
   0x7   : > { %1148 = sst [smem:[#allocation8_spill]] %s888_s26  ;;  %s28_s7 = sadd.s32 1, %s888_s26 }
   0x8   : > { %1149 = sst [smem:[#allocation9_spill]] %s892_s27  ;;  %p29_p0 = scmp.ge.s32.totalorder %s28_s7, 4 }
   0x9   : > { %s31_s8 = sadd.s32 1, %s892_s27  ;;  %p191_p1 = scmp.ne.s32.totalorder %s876_s23, %s872_s22 }
   0xa   : > { %p192_p2 = scmp.eq.s32.totalorder %s624_s29, 7  ;;  %s1168_s7 = smov (%p29_p0, %s28_s7), 0 }
   0xb   : > { %1150 = sst [smem:[#allocation10_spill]] %s1168_s7  ;;  %s1170_s8 = smov (!%p29_p0, %s31_s8), %s892_s27 }
   0xc   : > { %p983_p3 = por %p192_p2, %p191_p1  ;;  %p197_p4 = scmp.ne.s32.totalorder %s872_s22, %s868_s21 }
   0xd   : > { %p33_p5 = scmp.ge.s32.totalorder %s1170_s8, 2  ;;  %p198_p6 = scmp.eq.s32.totalorder %s625_s30, 7 }
   0xe   : > { %p628_p7 = scmp.ge.s32.totalorder %s896_s28, 1  ;;  %p252_p8 = scmp.lt.s32.totalorder %s896_s28, 9 }
   0xf   : > { %s1172_s8 = smov (%p33_p5, %s1170_s8), 0  ;;  %p993_p9 = por %p198_p6, %p197_p4 }
  0x10   : > { %1152 = sst [smem:[#allocation11_spill]] %s1172_s8  ;;  %p253_p10 = pnand %p628_p7, %p252_p8 }
  0x11   : > { %s1153_s10 = scalar_select %p993_p9, 1, 0 }
  0x12   : > { %s178_s11 = ssub.s32 %s892_s27, %s1172_s8  ;;  %s181_s12 = sadd.s32 1, %s876_s23 }
  0x13   : > { %1154 = sst [smem:[#allocation12_spill]] %s1153_s10  ;;  %p179_p11 = scmp.eq.s32.totalorder %s178_s11, 0 }
  0x14   : > { %256 = sbr.rel (%p253_p10) target bundleno = 393 (0x189), region = 44  ;;  %s1142_s14 = sand.u32 (!%p253_p10), 1, %s872_s22  }
  0x15   : > { %s1001_s13 = scalar_select %p179_p11, %s876_s23, %s181_s12  }
  0x16   : > { %p294_p12 = scmp.lt.s32.totalorder (!%p253_p10), %s884_s25, 1  ;;  %s721_s15 = smul.u32 (!%p253_p10), 24, %s1142_s14 }
  0x17   : > { %1155 = sst [smem:[#allocation13_spill]] %s1001_s13  ;;  %p296_p13 = scmp.lt.s32.totalorder (!%p253_p10), %s880_s24, 3 }
  0x18   : > { %s631_s17 = sshll.u32 (!%p253_p10), %s880_s24, 4  ;;  %s1022_s21 = scalar_lea.vmem (!%p253_p10), [#allocation3], %s721_s15 }
  0x19   : > { %s295_s16 = scalar_select %p294_p12, %s884_s25, 1 }
  0x1a   : > { %s297_s18 = scalar_select %p296_p13, %s880_s24, 3 }
  0x1b   : > { %s629_s19 = sshll.u32 %s295_s16, 2  ;;  %p303_p0 = scmp.lt.s32.totalorder %s631_s17, 63 }
  0x1c   : > { %s299_s20 = sadd.s32 %s629_s19, %s297_s18  ;;  %s633_s29 = sshll.u32 %s295_s16, 3 }
  0x1d   : > { %s630_s30 = sshll.u32 %s299_s20, 2  ;;  %s1014_s8 = scalar_lea.vmem %s1137_s5, %s633_s29 }
  0x1e   : > { %s301_s26 = scalar_lea.vmem %s1132_s0, %s630_s30  ;;  %s1174_s17 = smov (!%p303_p0, %s631_s17), 63 }
  0x1f   : > { %s632_s14 = sshll.u32 %s1174_s17, 2  ;;  %p634_p1 = scmp.ne.s32.totalorder %s880_s24, 0 }
  0x20   : > { %s306_s10 = scalar_lea.vmem %s1133_s1, %s632_s14 }
  0x21   : > { %316 = sbr.rel (%p634_p1) target bundleno = 40 (0x28), region = 48 }
  0x26   : > { %vm317_vm0 = vcmask 523264   ;;  %v898_v0 = vmov 0.0  }
  0x27   : > { %318 = vst.msk [vmem:[#allocation2] sm:$0xff] %vm317_vm0, %v898_v0 }
  0x28 PF: > { %v712_v1 = vld [vmem:[%s306_s10 + $0x38] sm:$0xff]  ;;  %v711_v2 = vld [vmem:[%s306_s10 + $0x30] sm:$0xff]  ;;  %v710_v3 = vld [vmem:[%s306_s10 + $0x28] sm:$0xff]  ;;  %vm399_vm1 = vcmask 523264   ;;  %p667_p2 = scmp.ne.s32.totalorder %s880_s24, 3 }
  0x29   : > { %385 = vmatpush.bf16.msra.mxu0 %v712_v1  ;;  %v709_v4 = vld [vmem:[%s306_s10 + $0x20] sm:$0xff]  ;;  %v708_v5 = vld [vmem:[%s306_s10 + $0x18] sm:$0xff]  ;;  %v707_v6 = vld [vmem:[%s306_s10 + $0x10] sm:$0xff] }
  0x2a   : > { %v706_v7 = vld [vmem:[%s306_s10 + $0x8] sm:$0xff]  ;;  %v705_v8 = vld [vmem:[%s306_s10] sm:$0xff] }
  0x2b   : > { %v320_v9 = vld [vmem:[%s301_s26] sm:$0xf] }
  0x2d   : > { %386 = vmatpush.bf16.msra.mxu0 %v711_v2 }
  0x2e   : > { %v319_v10 = vld [vmem:[#allocation2] sm:$0xff] }
  0x31   : > { %387 = vmatpush.bf16.msra.mxu0 %v710_v3 }
  0x35   : > { %388 = vmatpush.bf16.msra.mxu0 %v709_v4 }
  0x39   : > { %389 = vmatpush.bf16.msra.mxu0 %v708_v5 }
  0x3d   : > { %390 = vmatpush.bf16.msra.mxu0 %v707_v6 }
  0x41   : > { %391 = vmatpush.bf16.msra.mxu0 %v706_v7 }
  0x45   : > { %392 = vmatpush.bf16.msra.mxu0 %v705_v8 }
  0x48   : > { %393 = vmatmul.bf16.vlgmr.msra.gmra.mxu0 %v320_v9 }
  0xc5   : > { %v394_v11 = vpop.f32.mrf.mxu0 }
  0xc6   : > { %v398_v12 = vadd.f32 %v394_v11, %v319_v10 }
  0xc8   : > { %400 = vst.msk [vmem:[#allocation2] sm:$0xff] %vm399_vm1, %v398_v12 }
  0xc9   : > { %404 = sbr.rel (%p667_p2) target bundleno = 377 (0x179), region = 52 }
  0xcd   : > { %v396_v13 = vpop.f32.mrf.mxu0 }
  0xce   : > { %v719_v14 = vld [vmem:[%s1135_s3 + $0x34] sm:$0xf]  ;;  %v696_v15 = vld [vmem:[%s1135_s3 + $0x38] sm:$0xf0]  ;;  %v717_v16 = vld [vmem:[%s1135_s3 + $0x24] sm:$0xf] }
  0xcf   : > { %v699_v17 = vor.u32 %v719_v14, %v696_v15  ;;  %v688_v18 = vld [vmem:[%s1135_s3 + $0x28] sm:$0xf0]  ;;  %v715_v19 = vld [vmem:[%s1135_s3 + $0x14] sm:$0xf]  ;;  %v694_v20 = vld [vmem:[%s1135_s3 + $0x30] sm:$0xf] }
  0xd0   : > { %v720_v21 = vld [vmem:[%s1135_s3 + $0x34] sm:$0xf0]  ;;  %v691_v22 = vor.u32 %v717_v16, %v688_v18  ;;  %v680_v23 = vld [vmem:[%s1135_s3 + $0x18] sm:$0xf0]  ;;  %v686_v25 = vld [vmem:[%s1135_s3 + $0x20] sm:$0xf] }
  0xd1   : > { %487 = vmatpush.bf16.msra.mxu1 %v699_v17  ;;  %v695_v24 = vor.u32 %v720_v21, %v694_v20  ;;  %v718_v26 = vld [vmem:[%s1135_s3 + $0x24] sm:$0xf0]  ;;  %v405_v27 = vld [vmem:[#allocation2] sm:$0xff]  ;;  %v678_v31 = vld [vmem:[%s1135_s3 + $0x10] sm:$0xf]  ;;  %v683_v33 = vor.u32 %v715_v19, %v680_v23 }
  0xd2   : > { %v795_v28 = vld [vmem:[%s1134_s2] ss:$0 sm:$0xff]  ;;  %v687_v29 = vor.u32 %v718_v26, %v686_v25  ;;  %v716_v32 = vld [vmem:[%s1135_s3 + $0x14] sm:$0xf0]  ;;  %v713_v34 = vld [vmem:[%s1135_s3 + $0x4] sm:$0xf] }
  0xd3   : > { %474 = vmatpush.bf16.msra.mxu0 %v695_v24  ;;  %v410_v30 = vadd.f32 %v795_v28, %v405_v27  ;;  %v672_v35 = vld [vmem:[%s1135_s3 + $0x8] sm:$0xf0]  ;;  %v679_v36 = vor.u32 %v716_v32, %v678_v31  ;;  %v670_v37 = vld [vmem:[%s1135_s3] sm:$0xf]  ;;  %v714_v38 = vld [vmem:[%s1135_s3 + $0x4] sm:$0xf0] }
  0xd4   : > { %v675_v39 = vor.u32 %v713_v34, %v672_v35  ;;  %v671_v40 = vor.u32 %v714_v38, %v670_v37  ;;  %v421_v43 = vld [vmem:[%s1136_s4] sm:$0x3] }
  0xd5   : > { %488 = vmatpush.bf16.msra.mxu1 %v691_v22  ;;  %796 = vtanh.f32 %v410_v30  ;;  %v424_v44 = vperm.slane %v421_v43, 1  ;;  %v423_v45 = vperm.slane %v421_v43, 0  ;;  %v501_v56 = vld [vmem:[%s1014_s8] sm:$0xff] }
  0xd7   : > { %475 = vmatpush.bf16.msra.mxu0 %v687_v29 }
  0xd9   : > { %489 = vmatpush.bf16.msra.mxu1 %v683_v33 }
  0xdb   : > { %476 = vmatpush.bf16.msra.mxu0 %v679_v36  ;;  %v797_v41 = vpop.eup %796 }
  0xdc   : > { %v412_v42 = vpack.c.bf16 %v797_v41, %v797_v41 }
  0xdd   : > { %490 = vmatpush.bf16.msra.mxu1 %v675_v39 }
  0xdf   : > { %477 = vmatpush.bf16.msra.mxu0 %v671_v40 }
  0xe0   : > { %701 = vmatmul.msk.bf16.vlgmr.msra.gmra.mxu1 %vm399_vm1, %v412_v42 }
  0xe2   : > { %700 = vmatmul.msk.bf16.vlgmr.msra.gmra.mxu0 %vm399_vm1, %v412_v42 }
 0x15d   : > { %v492_v46 = vpop.f32.mrf.mxu1 }
 0x15e   : > { %v493_v47 = vadd.f32 %v492_v46, %v424_v44 }
 0x15f   : > { %v479_v48 = vpop.f32.mrf.mxu0 }
 0x160   : > { %v496_v49 = vsub.f32 0.0, %v493_v47  ;;  %v480_v50 = vadd.f32 %v479_v48, %v423_v45 }
 0x162   : > { %v497_v51 = vmul.f32 1.442695, %v496_v49  ;;  %505 = vst [vmem:[%s1022_s21 + $0x8] sm:$0xff] %v480_v50 }
 0x164   : > { %798 = vpow2.f32 %v497_v51 }
 0x165   : > { %v494_v52 = vpop.f32.mrf.mxu1 }
 0x167   : > { %v481_v53 = vpop.f32.mrf.mxu0 }
 0x16a   : > { %v799_v54 = vpop.eup %798 }
 0x16b   : > { %v499_v55 = vadd.f32 1.0, %v799_v54 }
 0x16d   : > { %800 = vrcp.f32 %v499_v55 }
 0x173   : > { %v801_v57 = vpop.eup %800 }
 0x174   : > { %506 = vst [vmem:[%s1022_s21 + $0x10] sm:$0xff] %v801_v57  ;;  %v502_v58 = vmul.f32 %v801_v57, %v501_v56 }
 0x176   : > { %v503_v59 = vadd.f32 %v502_v58, %v480_v50 }
 0x178   : > { %504 = vst [vmem:[%s1022_s21] sm:$0xff] %v503_v59 }
 0x179 PF: > { %s722_s23 = smul.u32 24, %s884_s25  ;;  %s521_s27 = sshll.u32 %s1022_s21, 4  ;;  %s522_s27 = int_to_ptr.vmem [resolvable:$true] %s521_s27 }
 0x17a   : > { %s1156_s8 = sand.u32 1, %s872_s22   ;;  %s822_s21 = scalar_lea.hbm %s1138_s6, 48 }
 0x17b   : > { %s519_s26 = scalar_lea.hbm %s1138_s6, %s722_s23  ;;  %s508_s14 = scalar_lea.sflag [#allocation4], %s1156_s8 }
 0x17c   : > { %s523_s10 = sshll.u32 %s519_s26, 4  ;;  %s524_s10 = int_to_ptr.hbm [resolvable:$true] %s523_s10 }
 0x17d   : > { %s816_s15 = sshra.s32 %s524_s10, 4  ;;  %s817_s15 = int_to_ptr.hbm [resolvable:$true] %s816_s15 }
 0x17e   : > { %s818_s16 = scalar_lea.hbm %s817_s15, 24  ;;  %p823_p7 = scmp.lt.s32.totalorder %s817_s15, %s1138_s6 }
 0x17f   : > { %p819_p4 = scmp.ne.s32.totalorder %s817_s15, %s818_s16  ;;  %p824_p8 = scmp.lt.s32.totalorder %s822_s21, %s818_s16 }
 0x181   : > { %p820_p5 = pnand %p819_p4, %p983_p3  ;;  %p825_p10 = por %p824_p8, %p823_p7 }
 0x183   : > { %p821_p6 = pneg %p820_p5 }
 0x185   : > { %p826_p11 = pnand %p825_p10, %p821_p6 }
 0x187   : > { %829 = shalt.err (!%p826_p11)
}
 0x188   : > { %723 = dma.vmem_to_hbm [thread:$0]  (%p983_p3), %s522_s27, 384, %s524_s10, %s508_s14  }
 0x189 PF: > { %s1157_s19 = sld [smem:[#allocation6_spill]]  ;;  %p729_p12 = scmp.ge.s32.totalorder %s896_s28, 2 }
 0x18b   : > { %p726_p13 = pnand %p729_p12, %p993_p9 }
 0x18d   : > { %p727_p0 = pneg %p726_p13 }
 0x18f   : > { %s535_s29 = sand.u32 1, %s1157_s19  }
 0x190   : > { %s536_s30 = scalar_lea.sflag [#allocation4], %s535_s29 }
 0x191   : > { %863 = dma.done.wait (%p727_p0), %s536_s30, 384  }
 0x192   : > { %865 = vsyncadd (%p727_p0), %s536_s30, 4294966912  ;;  %s19_s28 = sadd.s32 1, %s896_s28   ;;  %s1159_s11 = sld [smem:[#allocation7_spill]] }
 0x193   : > { %p16_p1 = scmp.ge.s32.totalorder %s19_s28, 10   ;;  %s1160_s23 = sld [smem:[#allocation13_spill]] }
 0x194   : > { %s1161_s24 = sld [smem:[#allocation8_spill]]  ;;  %s1165_s21 = smov %s872_s22 }
 0x195   : > { %s1162_s25 = sld [smem:[#allocation9_spill]]  ;;  %18 = sbr.rel (!%p16_p1) target bundleno = 5 (0x5), region = 93 }
 0x196   : > { %s1163_s26 = sld [smem:[#allocation10_spill]] }
 0x197   : > { %s1164_s27 = sld [smem:[#allocation11_spill]] }
 0x198   : > { %s1166_s22 = smov %s1159_s11 }
 0x19a   :  { %542 = vsyncpa [#allocation4], 1 }
 0x19b   :  { %544 = vsyncpa [#allocation4 + $0x1], 1 }

</bundles_post_ra>
